<compile_context>
chip_gen: v7x
topology: tpu7x:2x2x1
jax: 0.10.0
libtpu: 0.0.40
codegen_flags: <defaults>
</compile_context>

<pallas_src>
import functools

import jax
import jax.numpy as jnp
import numpy as np
from jax.experimental import pallas as pl
from jax.experimental.pallas import tpu as pltpu


def _ssim_kernel(cparams_ref, x_ref, y_ref, brow_ref, bcol_ref, out_ref, *,
                 win_size):
    # cparams_ref: SMEM (2,) = [c1, c2]
    c1 = cparams_ref[0]
    c2 = cparams_ref[1]

    x = x_ref[0]                      # (H, L) f32, tb images along lanes
    y = y_ref[0]
    brow = brow_ref[...]              # (ho, H)     banded ones (row pass)
    bcol = bcol_ref[...]              # (L, tb*wo)  block-diag banded ones (col pass)

    inv_area = 1.0 / float(win_size * win_size)
    cov_norm = float(win_size * win_size) / float(win_size * win_size - 1)

    def box(m):
        # Two MXU matmuls implement the separable valid box filter; 1/49 is
        # folded in once, in f32, after the exact-ones band accumulation.
        rows = jnp.dot(brow, m, preferred_element_type=jnp.float32)      # (ho, L)
        return jnp.dot(rows, bcol, preferred_element_type=jnp.float32) * inv_area

    ux = box(x)
    uy = box(y)
    uxx = box(x * x)
    uyy = box(y * y)
    uxy = box(x * y)

    vx = cov_norm * (uxx - ux * ux)
    vy = cov_norm * (uyy - uy * uy)
    vxy = cov_norm * (uxy - ux * uy)

    a1 = 2.0 * ux * uy + c1
    a2 = 2.0 * vxy + c2
    b1 = ux * ux + uy * uy + c1
    b2 = vx + vy + c2
    # Division via EUP reciprocal (own VLIW slot, frees VALU cycles).
    s = (a1 * a2) * pl.reciprocal(b1 * b2, approx=True)

    # Partial sum of the SSIM map for this group of tb images (scalar SMEM out;
    # no masked lane stores on the output path).
    out_ref[0, 0] = jnp.sum(s)


def _band_matrices(H, W, win_size, tb):
    """Banded-ones matrices for the separable valid box filter (built statically)."""
    ho, wo = H - win_size + 1, W - win_size + 1
    brow = np.zeros((ho, H), np.float32)
    for r in range(ho):
        brow[r, r:r + win_size] = 1.0
    bcol = np.zeros((tb * W, tb * wo), np.float32)
    for img in range(tb):
        for c in range(wo):
            bcol[img * W + c: img * W + c + win_size, img * wo + c] = 1.0
    return jnp.asarray(brow), jnp.asarray(bcol)


def ssim_loss(x, y, data_range, win_size=7, k1=0.01, k2=0.03):
    """Matches SSIMLoss.forward(x, y, data_range) for NCHW inputs with C=1."""
    N, C, H, W = x.shape
    assert C == 1, "SSIMLoss conv weight has a single input channel"
    ho, wo = H - win_size + 1, W - win_size + 1

    # Lane packing: process `tb` images per grid step, side by side along lanes
    # (largest divisor of N keeping the packed lane width modest).
    max_tb = max(1, 512 // W)
    tb = max(d for d in range(1, N + 1) if N % d == 0 and d <= max_tb)
    G = N // tb
    L = tb * W

    def pack(a):  # (N,1,H,W) -> (G, H, tb*W): wrapper-side lane-dense plumbing
        return (a.reshape(G, tb, H, W).astype(jnp.float32)
                 .transpose(0, 2, 1, 3).reshape(G, H, L))

    xp, yp = pack(x), pack(y)

    dr = jnp.asarray(data_range, jnp.float32)
    cparams = jnp.stack([(k1 * dr) ** 2, (k2 * dr) ** 2]).astype(jnp.float32)

    brow, bcol = _band_matrices(H, W, win_size, tb)

    kernel = functools.partial(_ssim_kernel, win_size=win_size)

    # Explicit scoped-VMEM budget: double-buffered x/y blocks + band matrices +
    # headroom for matmul operands and SSIM intermediates.
    est = 4 * (4 * H * L
               + 2 * (ho * H + L * tb * wo)
               + 6 * H * L + ho * L
               + 16 * ho * tb * wo)
    vmem_limit = int(min(max(2 * est, 32 * 1024 * 1024), 48 * 1024 * 1024))

    per_group_sums = pl.pallas_call(
        kernel,
        out_shape=jax.ShapeDtypeStruct((G, 1), jnp.float32),
        grid=(G,),
        in_specs=[
            pl.BlockSpec(memory_space=pltpu.SMEM),              # [c1, c2]
            pl.BlockSpec((1, H, L), lambda g: (g, 0, 0)),       # packed x
            pl.BlockSpec((1, H, L), lambda g: (g, 0, 0)),       # packed y
            pl.BlockSpec((ho, H), lambda g: (0, 0)),            # row band
            pl.BlockSpec((L, tb * wo), lambda g: (0, 0)),       # col band
        ],
        out_specs=pl.BlockSpec((1, 1), lambda g: (g, 0),
                               memory_space=pltpu.SMEM),
        compiler_params=pltpu.CompilerParams(
            dimension_semantics=("parallel",),
            vmem_limit_bytes=vmem_limit),
    )(cparams, xp, yp, brow, bcol)

    mean_s = jnp.sum(per_group_sums) / (N * ho * wo)
    return 1.0 - mean_s


def _ssim_loss_ref(x, y, data_range, win_size=7, k1=0.01, k2=0.03):
    # Pure-JAX reference (same math as the PyTorch module) for a sanity check.
    N, C, H, W = x.shape
    ho, wo = H - win_size + 1, W - win_size + 1
    dr = jnp.asarray(data_range, jnp.float32)
    c1 = (k1 * dr) ** 2
    c2 = (k2 * dr) ** 2
    cov_norm = win_size ** 2 / (win_size ** 2 - 1)

    def box(a):  # a: (N, H, W)
        row = sum(a[:, dy:dy + ho, :] for dy in range(win_size))
        out = sum(row[:, :, dx:dx + wo] for dx in range(win_size))
        return out / (win_size ** 2)

    xf = x.reshape(N, H, W).astype(jnp.float32)
    yf = y.reshape(N, H, W).astype(jnp.float32)
    ux, uy = box(xf), box(yf)
    uxx, uyy, uxy = box(xf * xf), box(yf * yf), box(xf * yf)
    vx = cov_norm * (uxx - ux * ux)
    vy = cov_norm * (uyy - uy * uy)
    vxy = cov_norm * (uxy - ux * uy)
    a1 = 2 * ux * uy + c1
    a2 = 2 * vxy + c2
    b1 = ux ** 2 + uy ** 2 + c1
    b2 = vx + vy + c2
    s = a1 * a2 / (b1 * b2)
    return 1 - s.mean()


if __name__ == "__main__":
    key = jax.random.PRNGKey(0)
    kx, ky = jax.random.split(key)

    N, C, H, W = 2, 1, 16, 16  # C must be 1 given the (1,1,7,7) conv weight
    x = jax.random.uniform(kx, (N, C, H, W), dtype=jnp.float32)
    y = jax.random.uniform(ky, (N, C, H, W), dtype=jnp.float32)
    data_range = jnp.float32(1.0)

    loss = jax.block_until_ready(ssim_loss(x, y, data_range))
    loss_ref = jax.block_until_ready(_ssim_loss_ref(x, y, data_range))

    assert jnp.isfinite(loss), "non-finite loss"
    # Approx EUP reciprocal + MXU box-filter accumulation differ from the
    # exact-division / shift-add reference only at the <~1e-3 level.
    assert abs(float(loss) - float(loss_ref)) < 2e-3, (float(loss), float(loss_ref))
    print("KERNEL_OK")
</pallas_src>

<mosaic_0001>
module attributes {stable_mosaic.version = 11 : i64} {
  func.func @_ssim_kernel(%arg0: i32, %arg1: memref<2xf32, #tpu.memory_space<smem>>, %arg2: memref<1x16x32xf32, #tpu.memory_space<vmem>>, %arg3: memref<1x16x32xf32, #tpu.memory_space<vmem>>, %arg4: memref<10x16xf32, #tpu.memory_space<vmem>>, %arg5: memref<32x20xf32, #tpu.memory_space<vmem>>, %arg6: memref<1x1xf32, #tpu.memory_space<smem>>) attributes {dimension_semantics = [#tpu.dimension_semantics<parallel>], iteration_bounds = array<i64: 1>, scalar_prefetch = 0 : i64, scratch_operands = 0 : i64, tpu.core_type = #tpu.core_type<tc>, window_params = [{transform_indices = @transform_0, window_bounds = array<i64: 2>}, {transform_indices = @transform_1, window_bounds = array<i64: 1, 16, 32>}, {transform_indices = @transform_2, window_bounds = array<i64: 1, 16, 32>}, {pipeline_mode = #tpu.pipeline_mode<synchronous>, transform_indices = @transform_3, window_bounds = array<i64: 10, 16>}, {pipeline_mode = #tpu.pipeline_mode<synchronous>, transform_indices = @transform_4, window_bounds = array<i64: 32, 20>}, {transform_indices = @transform_5, window_bounds = array<i64: 1, 1>}]} {
    %c0 = arith.constant 0 : index
    %0 = memref.load %arg1[%c0] : memref<2xf32, #tpu.memory_space<smem>>
    %c1 = arith.constant 1 : index
    %1 = memref.load %arg1[%c1] : memref<2xf32, #tpu.memory_space<smem>>
    %c0_0 = arith.constant 0 : index
    %c0_1 = arith.constant 0 : index
    %c0_2 = arith.constant 0 : index
    %2 = vector.load %arg2[%c0_0, %c0_1, %c0_2] : memref<1x16x32xf32, #tpu.memory_space<vmem>>, vector<1x16x32xf32>
    %3 = vector.shape_cast %2 : vector<1x16x32xf32> to vector<16x32xf32>
    %c0_3 = arith.constant 0 : index
    %c0_4 = arith.constant 0 : index
    %c0_5 = arith.constant 0 : index
    %4 = vector.load %arg3[%c0_3, %c0_4, %c0_5] : memref<1x16x32xf32, #tpu.memory_space<vmem>>, vector<1x16x32xf32>
    %5 = vector.shape_cast %4 : vector<1x16x32xf32> to vector<16x32xf32>
    %c0_6 = arith.constant 0 : index
    %c0_7 = arith.constant 0 : index
    %6 = vector.load %arg4[%c0_6, %c0_7] : memref<10x16xf32, #tpu.memory_space<vmem>>, vector<10x16xf32>
    %c0_8 = arith.constant 0 : index
    %c0_9 = arith.constant 0 : index
    %7 = vector.load %arg5[%c0_8, %c0_9] : memref<32x20xf32, #tpu.memory_space<vmem>>, vector<32x20xf32>
    %cst = arith.constant dense<0.000000e+00> : vector<10x32xf32>
    %8 = tpu.matmul %6, %3, %cst {dimension_numbers = #tpu.dot_dimension_numbers<[1], [0], [0], [1], [0, 0, 1, 1], [], []>} : vector<10x16xf32>, vector<16x32xf32>, vector<10x32xf32> -> vector<10x32xf32>
    %cst_10 = arith.constant dense<0.000000e+00> : vector<10x20xf32>
    %9 = tpu.matmul %8, %7, %cst_10 {dimension_numbers = #tpu.dot_dimension_numbers<[1], [0], [0], [1], [0, 0, 1, 1], [], []>} : vector<10x32xf32>, vector<32x20xf32>, vector<10x20xf32> -> vector<10x20xf32>
    %cst_11 = arith.constant 0.0204081628 : f32
    %10 = vector.broadcast %cst_11 : f32 to vector<10x20xf32>
    %11 = arith.mulf %9, %10 : vector<10x20xf32>
    %cst_12 = arith.constant dense<0.000000e+00> : vector<10x32xf32>
    %12 = tpu.matmul %6, %5, %cst_12 {dimension_numbers = #tpu.dot_dimension_numbers<[1], [0], [0], [1], [0, 0, 1, 1], [], []>} : vector<10x16xf32>, vector<16x32xf32>, vector<10x32xf32> -> vector<10x32xf32>
    %cst_13 = arith.constant dense<0.000000e+00> : vector<10x20xf32>
    %13 = tpu.matmul %12, %7, %cst_13 {dimension_numbers = #tpu.dot_dimension_numbers<[1], [0], [0], [1], [0, 0, 1, 1], [], []>} : vector<10x32xf32>, vector<32x20xf32>, vector<10x20xf32> -> vector<10x20xf32>
    %cst_14 = arith.constant 0.0204081628 : f32
    %14 = vector.broadcast %cst_14 : f32 to vector<10x20xf32>
    %15 = arith.mulf %13, %14 : vector<10x20xf32>
    %16 = arith.mulf %3, %3 : vector<16x32xf32>
    %cst_15 = arith.constant dense<0.000000e+00> : vector<10x32xf32>
    %17 = tpu.matmul %6, %16, %cst_15 {dimension_numbers = #tpu.dot_dimension_numbers<[1], [0], [0], [1], [0, 0, 1, 1], [], []>} : vector<10x16xf32>, vector<16x32xf32>, vector<10x32xf32> -> vector<10x32xf32>
    %cst_16 = arith.constant dense<0.000000e+00> : vector<10x20xf32>
    %18 = tpu.matmul %17, %7, %cst_16 {dimension_numbers = #tpu.dot_dimension_numbers<[1], [0], [0], [1], [0, 0, 1, 1], [], []>} : vector<10x32xf32>, vector<32x20xf32>, vector<10x20xf32> -> vector<10x20xf32>
    %cst_17 = arith.constant 0.0204081628 : f32
    %19 = vector.broadcast %cst_17 : f32 to vector<10x20xf32>
    %20 = arith.mulf %18, %19 : vector<10x20xf32>
    %21 = arith.mulf %5, %5 : vector<16x32xf32>
    %cst_18 = arith.constant dense<0.000000e+00> : vector<10x32xf32>
    %22 = tpu.matmul %6, %21, %cst_18 {dimension_numbers = #tpu.dot_dimension_numbers<[1], [0], [0], [1], [0, 0, 1, 1], [], []>} : vector<10x16xf32>, vector<16x32xf32>, vector<10x32xf32> -> vector<10x32xf32>
    %cst_19 = arith.constant dense<0.000000e+00> : vector<10x20xf32>
    %23 = tpu.matmul %22, %7, %cst_19 {dimension_numbers = #tpu.dot_dimension_numbers<[1], [0], [0], [1], [0, 0, 1, 1], [], []>} : vector<10x32xf32>, vector<32x20xf32>, vector<10x20xf32> -> vector<10x20xf32>
    %cst_20 = arith.constant 0.0204081628 : f32
    %24 = vector.broadcast %cst_20 : f32 to vector<10x20xf32>
    %25 = arith.mulf %23, %24 : vector<10x20xf32>
    %26 = arith.mulf %3, %5 : vector<16x32xf32>
    %cst_21 = arith.constant dense<0.000000e+00> : vector<10x32xf32>
    %27 = tpu.matmul %6, %26, %cst_21 {dimension_numbers = #tpu.dot_dimension_numbers<[1], [0], [0], [1], [0, 0, 1, 1], [], []>} : vector<10x16xf32>, vector<16x32xf32>, vector<10x32xf32> -> vector<10x32xf32>
    %cst_22 = arith.constant dense<0.000000e+00> : vector<10x20xf32>
    %28 = tpu.matmul %27, %7, %cst_22 {dimension_numbers = #tpu.dot_dimension_numbers<[1], [0], [0], [1], [0, 0, 1, 1], [], []>} : vector<10x32xf32>, vector<32x20xf32>, vector<10x20xf32> -> vector<10x20xf32>
    %cst_23 = arith.constant 0.0204081628 : f32
    %29 = vector.broadcast %cst_23 : f32 to vector<10x20xf32>
    %30 = arith.mulf %28, %29 : vector<10x20xf32>
    %31 = arith.mulf %11, %11 : vector<10x20xf32>
    %32 = arith.subf %20, %31 : vector<10x20xf32>
    %cst_24 = arith.constant 1.02083337 : f32
    %33 = vector.broadcast %cst_24 : f32 to vector<10x20xf32>
    %34 = arith.mulf %33, %32 : vector<10x20xf32>
    %35 = arith.mulf %15, %15 : vector<10x20xf32>
    %36 = arith.subf %25, %35 : vector<10x20xf32>
    %cst_25 = arith.constant 1.02083337 : f32
    %37 = vector.broadcast %cst_25 : f32 to vector<10x20xf32>
    %38 = arith.mulf %37, %36 : vector<10x20xf32>
    %39 = arith.mulf %11, %15 : vector<10x20xf32>
    %40 = arith.subf %30, %39 : vector<10x20xf32>
    %cst_26 = arith.constant 1.02083337 : f32
    %41 = vector.broadcast %cst_26 : f32 to vector<10x20xf32>
    %42 = arith.mulf %41, %40 : vector<10x20xf32>
    %cst_27 = arith.constant 2.000000e+00 : f32
    %43 = vector.broadcast %cst_27 : f32 to vector<10x20xf32>
    %44 = arith.mulf %43, %11 : vector<10x20xf32>
    %45 = arith.mulf %44, %15 : vector<10x20xf32>
    %46 = vector.broadcast %0 : f32 to vector<10x20xf32>
    %47 = arith.addf %45, %46 : vector<10x20xf32>
    %cst_28 = arith.constant 2.000000e+00 : f32
    %48 = vector.broadcast %cst_28 : f32 to vector<10x20xf32>
    %49 = arith.mulf %48, %42 : vector<10x20xf32>
    %50 = vector.broadcast %1 : f32 to vector<10x20xf32>
    %51 = arith.addf %49, %50 : vector<10x20xf32>
    %52 = arith.mulf %11, %11 : vector<10x20xf32>
    %53 = arith.mulf %15, %15 : vector<10x20xf32>
    %54 = arith.addf %52, %53 : vector<10x20xf32>
    %55 = vector.broadcast %0 : f32 to vector<10x20xf32>
    %56 = arith.addf %54, %55 : vector<10x20xf32>
    %57 = arith.addf %34, %38 : vector<10x20xf32>
    %58 = vector.broadcast %1 : f32 to vector<10x20xf32>
    %59 = arith.addf %57, %58 : vector<10x20xf32>
    %60 = arith.mulf %47, %51 : vector<10x20xf32>
    %61 = arith.mulf %56, %59 : vector<10x20xf32>
    %62 = tpu.reciprocal %61 {approx = true} : vector<10x20xf32> -> vector<10x20xf32>
    %63 = arith.mulf %60, %62 : vector<10x20xf32>
    %64 = vector.shape_cast %63 : vector<10x20xf32> to vector<1x10x20xf32>
    %cst_29 = arith.constant dense<0.000000e+00> : vector<1xf32>
    %65 = vector.multi_reduction <add>, %64, %cst_29 [1, 2] : vector<1x10x20xf32> to vector<1xf32>
    %66 = vector.shape_cast %65 : vector<1xf32> to vector<1x1x1xf32>
    %67 = vector.extract %66[0, 0, 0] : f32 from vector<1x1x1xf32>
    %c0_30 = arith.constant 0 : index
    %c0_31 = arith.constant 0 : index
    %68 = memref.load %arg6[%c0_30, %c0_31] : memref<1x1xf32, #tpu.memory_space<smem>>
    memref.store %67, %arg6[%c0_30, %c0_31] : memref<1x1xf32, #tpu.memory_space<smem>>
    return
  }
  func.func @transform_0(%arg0: i32) -> i32 {
    %c0_i32 = arith.constant 0 : i32
    %c0_i32_0 = arith.constant 0 : i32
    return %c0_i32 : i32
  }
  func.func @transform_1(%arg0: i32) -> (i32, i32, i32) {
    %c0_i32 = arith.constant 0 : i32
    %c0_i32_0 = arith.constant 0 : i32
    %c0_i32_1 = arith.constant 0 : i32
    return %arg0, %c0_i32, %c0_i32_0 : i32, i32, i32
  }
  func.func @transform_2(%arg0: i32) -> (i32, i32, i32) {
    %c0_i32 = arith.constant 0 : i32
    %c0_i32_0 = arith.constant 0 : i32
    %c0_i32_1 = arith.constant 0 : i32
    return %arg0, %c0_i32, %c0_i32_0 : i32, i32, i32
  }
  func.func @transform_3(%arg0: i32) -> (i32, i32) {
    %c0_i32 = arith.constant 0 : i32
    %c0_i32_0 = arith.constant 0 : i32
    %c0_i32_1 = arith.constant 0 : i32
    return %c0_i32, %c0_i32_0 : i32, i32
  }
  func.func @transform_4(%arg0: i32) -> (i32, i32) {
    %c0_i32 = arith.constant 0 : i32
    %c0_i32_0 = arith.constant 0 : i32
    %c0_i32_1 = arith.constant 0 : i32
    return %c0_i32, %c0_i32_0 : i32, i32
  }
  func.func @transform_5(%arg0: i32) -> (i32, i32) {
    %c0_i32 = arith.constant 0 : i32
    %c0_i32_0 = arith.constant 0 : i32
    return %arg0, %c0_i32 : i32, i32
  }
}

</mosaic_0001>

<bundles_post_ra>
// kernel: tpu_custom_call.1
= control target key start
LH: loop header
LB: loop body
LE: loop exit
PB: predicated region body
PF: predicated region fallthrough
CT: control target
= control target key end

     0   :  { %10 = vsyncpa [#allocation4], 0  ;;  %s1322_s0 = inlined_call_operand.vmem [shape: f32[2], index: 0, kind: input, shape index: {}]   ;;  %s1323_s1 = inlined_call_operand.vmem [shape: f32[1,16,32], index: 1, kind: input, shape index: {}]   ;;  %s1324_s2 = inlined_call_operand.vmem [shape: f32[1,16,32], index: 2, kind: input, shape index: {}]   ;;  %s1325_s3 = inlined_call_operand.vmem [shape: f32[10,16], index: 3, kind: input, shape index: {}]   ;;  %s1326_s4 = inlined_call_operand.vmem [shape: f32[32,20], index: 4, kind: input, shape index: {}]   ;;  %s1327_s5 = inlined_call_operand.hbm [shape: f32[1,1], index: 5, kind: output, shape index: {}]  }
   0x1   :  { %11 = vsyncpa [#allocation3], 0  ;;  %s18_s20 = sshll.u32 %s1322_s0, 4  ;;  %s19_s20 = int_to_ptr.vmem [resolvable:$true] %s18_s20 }
   0x2   :  { %s1155_s21 = scalar_lea.vmem %s19_s20, 16  ;;  %p1160_p1 = scmp.lt.s32.totalorder %s19_s20, %s19_s20 }
   0x3   :  { %p1156_p0 = scmp.ne.s32.totalorder %s19_s20, %s1155_s21  ;;  %p1161_p2 = scmp.lt.s32.totalorder %s1155_s21, %s1155_s21 }
   0x5   :  { %p1162_p3 = por %p1161_p2, %p1160_p1 }
   0x7   :  { %p1163_p4 = pnand %p1162_p3, %p1156_p0 }
   0x9   :  { %1166 = shalt.err (!%p1163_p4)
}
   0xa   :  { %s1181_s22 = smov [#allocation2]  }
   0xb   :  { %21 = dma.vmem_to_smem %s19_s20, 16, %s1181_s22, [#allocation4]  }
   0xc   :  { %1177 = dma.done.wait [#allocation4], 16  }
   0xd   :  { %1178 = vsyncadd [#allocation4], 4294967280 }
   0xe   :  { %33 = sfence }
   0xf   :  { %v36_v0 = vld [vmem:[%s1323_s1] sm:$0xff]  ;;  %v37_v1 = vld [vmem:[%s1323_s1 + $0x8] sm:$0xff]  ;;  %vm46_vm0 = vcmask 130048   ;;  %v44_v9 = vld [vmem:[%s1326_s4 + $0x10] sm:$0xff]  ;;  %vm128_vm1 = vcmask 261120   ;;  %vm898_vm2 = vcmask 156672  }
  0x10   :  { %v1225_v2 = vld [vmem:[%s1325_s3] sm:$0xff]  ;;  %v1087_v3 = vpack.c.bf16 %v37_v1, %v36_v0  ;;  %v39_v5 = vld [vmem:[%s1324_s2 + $0x8] sm:$0xff]  ;;  %v45_v11 = vld [vmem:[%s1326_s4 + $0x18] sm:$0xff]  ;;  %v370_v14 = vmul.f32 %v36_v0, %v36_v0  ;;  %v371_v15 = vmul.f32 %v37_v1, %v37_v1  ;;  %vm896_vm3 = vcmask 162816   ;;  %s1167_s18 = scalar_lea.hbm %s1327_s5, 16 }
  0x11   :  { %1001 = vmatprep.mubr.msk.f32.mxu0 %vm46_vm0, %v1225_v2  ;;  %v38_v4 = vld [vmem:[%s1324_s2] sm:$0xff]  ;;  %v43_v8 = vld [vmem:[%s1326_s4 + $0x8] sm:$0xff]  ;;  %v1254_v13 = vpack.c.bf16 %v45_v11, %v44_v9  ;;  %v531_v18 = vmul.f32 %v39_v5, %v39_v5  ;;  %v691_v25 = vmul.f32 %v39_v5, %v37_v1  ;;  %p1168_p5 = scmp.ne.s32.totalorder %s1327_s5, %s1167_s18  ;;  %p1171_p6 = scmp.lt.u32.totalorder %s1167_s18, %s1327_s5 }
  0x12   :  { %v1099_v6 = vpack.c.bf16 %v39_v5, %v38_v4  ;;  %v42_v7 = vld [vmem:[%s1326_s4] sm:$0xff]  ;;  %1088 = vmatprep.subr.bf16.mxu0 %v1087_v3  ;;  %v1252_v12 = vld [vmem:[%s1325_s3 + $0x8] sm:$0x3]  ;;  %v1111_v16 = vpack.c.bf16 %v371_v15, %v370_v14  ;;  %v530_v17 = vmul.f32 %v38_v4, %v38_v4  ;;  %v690_v24 = vmul.f32 %v38_v4, %v36_v0  ;;  %s926_s3 = sld [smem:[#allocation2 + $0x1]]  ;;  %s34_s4 = sld [smem:[#allocation2]] }
  0x13   :  { %v1244_v10 = vpack.c.bf16 %v43_v8, %v42_v7  ;;  %1090 = vmatpush3.bf16.msra.mxu0 %v1087_v3  ;;  %p1173_p7 = pnand %p1171_p6, %p1168_p5 }
  0x14   :  { %1100 = vmatprep.subr.bf16.mxu0 %v1099_v6  ;;  %v1123_v19 = vpack.c.bf16 %v531_v18, %v530_v17  ;;  %v1135_v26 = vpack.c.bf16 %v691_v25, %v690_v24 }
  0x15   :  { %1092 = vmatprep.subr.bf16.mxu1 %v1244_v10 }
  0x16   :  { %1094 = vmatpush3.bf16.msra.mxu1 %v1244_v10  ;;  %1002 = vmatmul.mubr.msk.f32.vlgmr.msra.gmra.mrb[0].mxu0 %vm46_vm0, %v1252_v12 }
  0x17   :  { %1096 = vmatprep.subr.bf16.mxu1 %v1254_v13  ;;  %1102 = vmatpush3.bf16.msra.mxu0 %v1099_v6 }
  0x18   :  { %1019 = vmatprep.mubr.msk.f32.mxu0 %vm46_vm0, %v1225_v2  ;;  %1104 = vmatprep.subr.bf16.mxu0 %v1244_v10  ;;  %v877_v4 = vstv %s926_s3  ;;  %v872_v7 = vstv %s34_s4 }
  0x1a   :  { %1098 = vmatpush3.bf16.msra.mxu1 %v1254_v13  ;;  %1020 = vmatmul.mubr.msk.f32.vlgmr.msra.gmra.mrb[2].mxu0 %vm46_vm0, %v1252_v12 }
  0x1b   :  { %1106 = vmatpush3.bf16.msra.mxu0 %v1244_v10  ;;  %1112 = vmatprep.subr.bf16.mxu1 %v1111_v16 }
  0x1c   :  { %1108 = vmatprep.subr.bf16.mxu0 %v1254_v13 }
  0x1f   :  { %1110 = vmatpush3.bf16.msra.mxu0 %v1254_v13 }
  0x20   :  { %1124 = vmatprep.subr.bf16.mxu0 %v1123_v19 }
  0xe9   :  { %v1003_v20 = vpop.f32.mrb[0].mxu0 }
  0xea   :  { %v119_v21 = vpop.f32.mrb[1].mxu0 }
  0xeb   :  { %1012 = vmatprep.mubr.msk.f32.mxu1 %vm128_vm1, %v119_v21 }
  0xec   :  { %1013 = vmatmul.mubr.msk.f32.vlgmr.msra.gmra.mrb[0].mxu1 %vm128_vm1, %v1003_v20 }
  0xed   :  { %1114 = vmatpush3.bf16.msra.mxu1 %v1111_v16  ;;  %v1021_v22 = vpop.f32.mrb[2].mxu0  ;;  %1037 = vmatprep.mubr.msk.f32.mxu1 %vm46_vm0, %v1225_v2 }
  0xee   :  { %v278_v23 = vpop.f32.mrb[3].mxu0  ;;  %1116 = vmatprep.subr.bf16.mxu1 %v1244_v10 }
  0xef   :  { %1030 = vmatprep.mubr.msk.f32.mxu0 %vm128_vm1, %v278_v23 }
  0xf0   :  { %1031 = vmatmul.mubr.msk.f32.vlgmr.msra.gmra.mrb[4].mxu0 %vm128_vm1, %v1021_v22  ;;  %1038 = vmatmul.mubr.msk.f32.vlgmr.msra.gmra.mrb[2].mxu1 %vm46_vm0, %v1252_v12 }
  0xf1   :  { %1126 = vmatpush3.bf16.msra.mxu0 %v1123_v19  ;;  %1055 = vmatprep.mubr.msk.f32.mxu0 %vm46_vm0, %v1225_v2 }
  0xf2   :  { %1118 = vmatpush3.bf16.msra.mxu1 %v1244_v10  ;;  %1128 = vmatprep.subr.bf16.mxu0 %v1244_v10 }
  0xf3   :  { %1120 = vmatprep.subr.bf16.mxu1 %v1254_v13 }
  0xf4   :  { %1056 = vmatmul.mubr.msk.f32.vlgmr.msra.gmra.mrb[6].mxu0 %vm46_vm0, %v1252_v12 }
  0xf5   :  { %1130 = vmatpush3.bf16.msra.mxu0 %v1244_v10 }
  0xf6   :  { %1122 = vmatpush3.bf16.msra.mxu1 %v1254_v13  ;;  %1132 = vmatprep.subr.bf16.mxu0 %v1254_v13 }
  0xf7   :  { %1136 = vmatprep.subr.bf16.mxu1 %v1135_v26 }
  0xf9   :  { %1134 = vmatpush3.bf16.msra.mxu0 %v1254_v13 }
 0x1bf   :  { %v1014_v27 = vpop.f32.mrb[0].mxu1 }
 0x1c0   :  { %v211_v28 = vmul.f32 0.020408163, %v1014_v27  ;;  %v201_v29 = vpop.f32.mrb[1].mxu1 }
 0x1c1   :  { %v210_v30 = vmul.f32 0.020408163, %v201_v29 }
 0x1c2   :  { %v869_v33 = vmul.f32 2.0, %v211_v28  ;;  %v851_v39 = vmul.f32 %v211_v28, %v211_v28 }
 0x1c3   :  { %v1032_v31 = vpop.f32.mrb[4].mxu0  ;;  %v1039_v32 = vpop.f32.mrb[2].mxu1  ;;  %v868_v37 = vmul.f32 2.0, %v210_v30  ;;  %v850_v41 = vmul.f32 %v210_v30, %v210_v30 }
 0x1c4   :  { %v369_v34 = vmul.f32 0.020408163, %v1032_v31  ;;  %v359_v35 = vpop.f32.mrb[5].mxu0  ;;  %v438_v36 = vpop.f32.mrb[3].mxu1 }
 0x1c5   :  { %v368_v38 = vmul.f32 0.020408163, %v359_v35  ;;  %1048 = vmatprep.mubr.msk.f32.mxu1 %vm128_vm1, %v438_v36 }
 0x1c6   :  { %v1291_v40 = vmul.f32 %v869_v33, %v369_v34  ;;  %1049 = vmatmul.mubr.msk.f32.vlgmr.msra.gmra.mrb[4].mxu1 %vm128_vm1, %v1039_v32  ;;  %v857_v42 = vmul.f32 %v369_v34, %v369_v34  ;;  %v863_v43 = vmul.f32 %v369_v34, %v211_v28 }
 0x1c7   :  { %v1294_v44 = vmul.f32 %v868_v37, %v368_v38  ;;  %1138 = vmatpush3.bf16.msra.mxu1 %v1135_v26  ;;  %v1057_v45 = vpop.f32.mrb[6].mxu0  ;;  %1073 = vmatprep.mubr.msk.f32.mxu1 %vm46_vm0, %v1225_v2  ;;  %v856_v46 = vmul.f32 %v368_v38, %v368_v38  ;;  %v862_v47 = vmul.f32 %v368_v38, %v210_v30 }
 0x1c8   :  { %v598_v48 = vpop.f32.mrb[7].mxu0  ;;  %1140 = vmatprep.subr.bf16.mxu1 %v1244_v10  ;;  %v881_v49 = vadd.f32 %v857_v42, %v851_v39  ;;  %v874_v26 = vadd.f32 %v872_v7, %v1291_v40 }
 0x1c9   :  { %1066 = vmatprep.mubr.msk.f32.mxu0 %vm128_vm1, %v598_v48  ;;  %v880_v50 = vadd.f32 %v856_v46, %v850_v41  ;;  %v873_v28 = vadd.f32 %v872_v7, %v1294_v44 }
 0x1ca   :  { %1067 = vmatmul.mubr.msk.f32.vlgmr.msra.gmra.mrb[8].mxu0 %vm128_vm1, %v1057_v45  ;;  %1074 = vmatmul.mubr.msk.f32.vlgmr.msra.gmra.mrb[6].mxu1 %vm46_vm0, %v1252_v12  ;;  %v883_v9 = vadd.f32 %v881_v49, %v872_v7 }
 0x1cb   :  { %1142 = vmatpush3.bf16.msra.mxu1 %v1244_v10  ;;  %v882_v11 = vadd.f32 %v880_v50, %v872_v7 }
 0x1cc   :  { %1144 = vmatprep.subr.bf16.mxu1 %v1254_v13 }
 0x1cf   :  { %1146 = vmatpush3.bf16.msra.mxu1 %v1254_v13 }
 0x299   :  { %v1050_v51 = vpop.f32.mrb[4].mxu1 }
 0x29a   :  { %v529_v52 = vmul.f32 0.020408163, %v1050_v51  ;;  %v519_v53 = vpop.f32.mrb[5].mxu1 }
 0x29b   :  { %v528_v54 = vmul.f32 0.020408163, %v519_v53 }
 0x29c   :  { %v853_v55 = vsub.f32 %v529_v52, %v851_v39 }
 0x29d   :  { %v852_v56 = vsub.f32 %v528_v54, %v850_v41  ;;  %v1068_v57 = vpop.f32.mrb[8].mxu0  ;;  %v1075_v58 = vpop.f32.mrb[6].mxu1 }
 0x29e   :  { %v689_v59 = vmul.f32 0.020408163, %v1068_v57  ;;  %v679_v60 = vpop.f32.mrb[9].mxu0  ;;  %v758_v61 = vpop.f32.mrb[7].mxu1  ;;  %v855_v1 = vmul.f32 1.0208334, %v853_v55 }
 0x29f   :  { %v688_v62 = vmul.f32 0.020408163, %v679_v60  ;;  %1084 = vmatprep.mubr.msk.f32.mxu1 %vm128_vm1, %v758_v61  ;;  %v854_v3 = vmul.f32 1.0208334, %v852_v56 }
 0x2a0   :  { %v859_v63 = vsub.f32 %v689_v59, %v857_v42  ;;  %1085 = vmatmul.mubr.msk.f32.vlgmr.msra.gmra.mrb[8].mxu1 %vm128_vm1, %v1075_v58 }
 0x2a1   :  { %v858_v0 = vsub.f32 %v688_v62, %v856_v46 }
 0x2a2   :  { %v861_v2 = vmul.f32 1.0208334, %v859_v63 }
 0x2a3   :  { %v860_v5 = vmul.f32 1.0208334, %v858_v0 }
 0x2a4   :  { %v885_v6 = vadd.f32 %v861_v2, %v855_v1 }
 0x2a5   :  { %v884_v8 = vadd.f32 %v860_v5, %v854_v3 }
 0x2a6   :  { %v887_v10 = vadd.f32 %v885_v6, %v877_v4 }
 0x2a7   :  { %v886_v12 = vadd.f32 %v884_v8, %v877_v4 }
 0x2a8   :  { %v891_v13 = vmul.f32 %v887_v10, %v883_v9 }
 0x2a9   :  { %v890_v14 = vmul.f32 %v886_v12, %v882_v11 }
 0x2aa   :  { %1151 = vrcp.f32 %v891_v13 }
 0x2ab   :  { %1153 = vrcp.f32 %v890_v14 }
 0x2b4   :  { %v1152_v30 = vpop.eup %1151 }
 0x2b5   :  { %v1154_v32 = vpop.eup %1153 }
 0x373   :  { %v1086_v15 = vpop.f32.mrb[8].mxu1 }
 0x374   :  { %v849_v16 = vmul.f32 0.020408163, %v1086_v15  ;;  %v839_v17 = vpop.f32.mrb[9].mxu1 }
 0x375   :  { %v848_v18 = vmul.f32 0.020408163, %v839_v17 }
 0x376   :  { %v865_v19 = vsub.f32 %v849_v16, %v863_v43 }
 0x377   :  { %v864_v20 = vsub.f32 %v848_v18, %v862_v47 }
 0x378   :  { %v867_v21 = vmul.f32 1.0208334, %v865_v19 }
 0x379   :  { %v866_v22 = vmul.f32 1.0208334, %v864_v20 }
 0x37a   :  { %v876_v23 = vmul.f32 2.0, %v867_v21 }
 0x37b   :  { %v875_v24 = vmul.f32 2.0, %v866_v22 }
 0x37c   :  { %v879_v25 = vadd.f32 %v877_v4, %v876_v23 }
 0x37d   :  { %v878_v27 = vadd.f32 %v877_v4, %v875_v24 }
 0x37e   :  { %v889_v29 = vmul.f32 %v879_v25, %v874_v26 }
 0x37f   :  { %v888_v31 = vmul.f32 %v878_v27, %v873_v28 }
 0x380   :  { %v895_v33 = vmul.f32 %v1152_v30, %v889_v29 }
 0x381   :  { %v894_v34 = vmul.f32 %v1154_v32, %v888_v31 }
 0x382   :  { %v899_v35 = vsel %vm898_vm2, %v895_v33, 0.0 }
 0x383   :  { %v897_v36 = vsel %vm896_vm3, %v894_v34, 0.0 }
 0x384   :  { %v900_v37 = vadd.f32 %v899_v35, %v897_v36 }
 0x386   :  { %901 = vadd.xlane.f32.xlu0 %v900_v37 }
 0x413   :  { %v902_v38 = vpop.xlane.xlu0 %901 }
 0x414   :  { %v903_v39 = vrot.slane %v902_v38, 4 }
 0x416   :  { %v904_v41 = vadd.f32 %v903_v39, %v902_v38 }
 0x418   :  { %v905_v42 = vrot.slane %v904_v41, 2 }
 0x41a   :  { %v906_v40 = vadd.f32 %v905_v42, %v904_v41 }
 0x41c   :  { %v907_v43 = vrot.slane %v906_v40, 1 }
 0x41e   :  { %v908_v45 = vadd.f32 %v907_v43, %v906_v40 }
 0x420   :  { %1147 = vpush %v908_v45 }
 0x451   :  { %s1148_s15 = spop %1147 }
 0x452   :  { %911 = sst [smem:[#allocation5]] %s1148_s15 }
 0x453   :  { %1176 = shalt.err (!%p1173_p7)
}
 0x454   :  { %s1182_s23 = smov [#allocation5]  }
 0x455   :  { %919 = dma.smem_to_hbm %s1182_s23, 16, %s1327_s5, [#allocation3]  }
 0x456   :  { %1179 = dma.done.wait [#allocation3], 16  }
 0x457   :  { %1180 = vsyncadd [#allocation3], 4294967280 }
 0x458   :  { %923 = sfence }
 0x459   :  { %924 = vsyncpa [#allocation3], 1 }
 0x45a   :  { %925 = vsyncpa [#allocation4], 1 }

</bundles_post_ra>
